<compile_context>
chip_gen: v6e
topology: v6e:2x2x1
jax: 0.10.0
libtpu: 0.0.40
codegen_flags: <defaults>
</compile_context>

<pallas_src>
import math
import functools
import numpy as np
import jax
import jax.numpy as jnp
from jax.experimental import pallas as pl
from jax.experimental.pallas import tpu as pltpu


_SMEM = pltpu.MemorySpace.SMEM
_VMEM_LIMIT = 32 * 1024 * 1024  # safe on v5e/v6e (128 MiB) and v7x (64 MiB)
_LOG_LO = math.log(1e-4)
_LOG_HI = math.log(1.0 - 1e-4)


def _round_up(x, m):
    return ((x + m - 1) // m) * m


# --------------------------- Pallas kernels ---------------------------------

def _focal_reg_kernel(pred_ref, gt_ref, pwh_ref, twh_ref, preg_ref, treg_ref,
                      mask_ref, out_ref, *, rows_total, block_rows, ragged):
    """Fused focal-loss partial sums + tiny masked-L1 sums.

    pred_ref/gt_ref: (block_rows, lane) tiles of the flattened heatmap.
    pwh/twh/preg/treg/mask: (1, P) resident flattened reg-head arrays.
    out_ref: (5,) SMEM resident accumulator:
        [sum(pos_loss+neg_loss), num_pos, sum m*|wh diff|, sum m*|off diff|, sum m]
    """
    i = pl.program_id(0)

    @pl.when(i == 0)
    def _():
        m = mask_ref[...]
        out_ref[0] = jnp.float32(0.0)
        out_ref[1] = jnp.float32(0.0)
        out_ref[2] = jnp.sum(m * jnp.abs(pwh_ref[...] - twh_ref[...]))
        out_ref[3] = jnp.sum(m * jnp.abs(preg_ref[...] - treg_ref[...]))
        out_ref[4] = jnp.sum(m)

    x = pred_ref[...]
    gt = gt_ref[...]
    if ragged:
        # last row tile reads past the array; zero those contributions
        row = jax.lax.broadcasted_iota(jnp.int32, x.shape, 0) + i * block_rows
        ok = row < rows_total
        x = jnp.where(ok, x, 0.0)
        gt = jnp.where(ok, gt, 2.0)          # gt=2 -> neither pos nor neg

    # Stable log-sigmoid path: exp + log + div per element (vs sigmoid + 2 logs).
    # Clamp in the log domain reproduces torch's clamp(sigmoid(x), 1e-4, 1-1e-4)
    # exactly (log is monotone).
    t = jnp.exp(-jnp.abs(x))
    sp0 = jnp.log(1.0 + t)                   # softplus(-|x|)
    inv = 1.0 / (1.0 + t)
    p = jnp.where(x >= 0, inv, t * inv)      # sigmoid(x)
    p = jnp.clip(p, 1e-4, 1.0 - 1e-4)
    omp = 1.0 - p
    log_p = jnp.clip(jnp.minimum(x, 0.0) - sp0, _LOG_LO, _LOG_HI)
    log_omp = jnp.clip(-jnp.maximum(x, 0.0) - sp0, _LOG_LO, _LOG_HI)

    pos = (gt == 1.0).astype(jnp.float32)
    neg = (gt < 1.0).astype(jnp.float32)
    omg = 1.0 - gt
    omg2 = omg * omg
    neg_w = omg2 * omg2                      # (1-gt)^4 via VALU squarings

    pos_loss = log_p * (omp * omp) * pos
    neg_loss = log_omp * (p * p) * neg_w * neg

    # pos_loss == 0 whenever num_pos == 0, so a single combined accumulator is
    # exact; wrapper divides by max(num_pos, 1).
    out_ref[0] = out_ref[0] + jnp.sum(pos_loss + neg_loss)
    out_ref[1] = out_ref[1] + jnp.sum(pos)


def _id_ce_kernel(xn_ref, valid_ref, tl_ref, w_ref, b_ref, out_ref,
                  m_ref, l_ref):
    """Streaming cross-entropy over class tiles (online softmax).

    xn:    (Np, Dp)  bf16 normalized+scaled embeddings (resident)
    valid: (Np, 1)   f32 row validity (reg_mask>0 & id!=-1)
    tl:    (Np, 1)   f32 target logit (hoisted out of the class loop)
    w:     (Dp, tn)  bf16 class tile of classifier.weight.T (pipelined)
    b:     (1, tn)   f32 bias tile (padded classes = -1e30)
    """
    j = pl.program_id(0)

    @pl.when(j == 0)
    def _():
        m_ref[...] = jnp.full_like(m_ref, -jnp.inf)
        l_ref[...] = jnp.zeros_like(l_ref)

    # bf16 operands on the MXU, f32 accumulation; f32 bias added after the dot.
    logits = jnp.dot(xn_ref[...], w_ref[...],
                     preferred_element_type=jnp.float32) + b_ref[...]

    tile_max = jnp.max(logits, axis=-1, keepdims=True)
    m_new = jnp.maximum(m_ref[...], tile_max)
    alpha = jnp.exp(m_ref[...] - m_new)
    l_ref[...] = alpha * l_ref[...] + jnp.sum(jnp.exp(logits - m_new),
                                              axis=-1, keepdims=True)
    m_ref[...] = m_new

    @pl.when(j == pl.num_programs(0) - 1)
    def _():
        per_row = (m_ref[...] + jnp.log(l_ref[...])) - tl_ref[...]
        v = valid_ref[...]
        out_ref[0] = jnp.sum(per_row * v)
        out_ref[1] = jnp.sum(v)


# --------------------------- kernel wrappers ---------------------------------

def focal_and_reg_sums(pred_hm, gt_hm, pred_wh, tgt_wh, pred_reg, tgt_reg,
                       mask_exp):
    """Fused focal partial sums + masked-L1 sums. Returns a (5,) f32 vector."""
    total = int(np.prod(pred_hm.shape))
    pred_f = pred_hm.reshape(-1).astype(jnp.float32)
    gt_f = gt_hm.reshape(-1).astype(jnp.float32)

    lane = None
    for cand in (512, 256, 128):
        if total % cand == 0:
            lane = cand
            break
    if lane is None:
        # TODO(synk): rare fallback (total not a multiple of 128) pads a copy.
        lane = 128
        pad = _round_up(total, lane) - total
        pred_f = jnp.pad(pred_f, (0, pad))
        gt_f = jnp.pad(gt_f, (0, pad), constant_values=2.0)
        total = total + pad

    rows = total // lane
    pred2d = pred_f.reshape(rows, lane)      # pure reshape -> no HBM copy
    gt2d = gt_f.reshape(rows, lane)

    if rows <= 1024:
        block_rows = rows                    # single full-dim tile
    else:
        block_rows = 1024                    # ~2 MB / buffer / input at lane=512
    grid_rows = pl.cdiv(rows, block_rows)
    ragged = (rows % block_rows) != 0

    def flat(x):
        v = x.reshape(-1).astype(jnp.float32)
        pad = _round_up(int(v.shape[0]), 128) - int(v.shape[0])
        return jnp.pad(v, (0, pad)).reshape(1, -1)

    small = [flat(a) for a in (pred_wh, tgt_wh, pred_reg, tgt_reg, mask_exp)]

    in_specs = [pl.BlockSpec((block_rows, lane), lambda i: (i, 0)),
                pl.BlockSpec((block_rows, lane), lambda i: (i, 0))]
    for a in small:
        in_specs.append(pl.BlockSpec((1, int(a.shape[1])), lambda i: (0, 0)))

    kern = functools.partial(_focal_reg_kernel, rows_total=rows,
                             block_rows=block_rows, ragged=ragged)
    return pl.pallas_call(
        kern,
        out_shape=jax.ShapeDtypeStruct((5,), jnp.float32),
        grid=(grid_rows,),
        in_specs=in_specs,
        out_specs=pl.BlockSpec((5,), lambda i: (0,), memory_space=_SMEM),
        compiler_params=pltpu.CompilerParams(
            dimension_semantics=("arbitrary",),
            vmem_limit_bytes=_VMEM_LIMIT),
        cost_estimate=pl.CostEstimate(
            flops=int(25 * total),
            transcendentals=int(2 * total),
            bytes_accessed=int(8 * total)),
    )(pred2d, gt2d, *small)


def id_ce_sums(xn_bf16, valid, tgt_logit, w_t_pad, b_pad, class_tile):
    """Streaming cross-entropy: returns (sum of valid CE, number of valid)."""
    Np, Dp = xn_bf16.shape
    nid_pad = w_t_pad.shape[1]
    grid = (nid_pad // class_tile,)

    return pl.pallas_call(
        _id_ce_kernel,
        out_shape=jax.ShapeDtypeStruct((2,), jnp.float32),
        grid=grid,
        in_specs=[
            pl.BlockSpec((Np, Dp), lambda j: (0, 0)),          # bf16 feats (resident)
            pl.BlockSpec((Np, 1), lambda j: (0, 0)),           # valid mask
            pl.BlockSpec((Np, 1), lambda j: (0, 0)),           # target logits
            pl.BlockSpec((Dp, class_tile), lambda j: (0, j)),  # bf16 W tile (pipelined)
            pl.BlockSpec((1, class_tile), lambda j: (0, j)),   # f32 bias tile
        ],
        out_specs=pl.BlockSpec((2,), lambda j: (0,), memory_space=_SMEM),
        scratch_shapes=[
            pltpu.VMEM((Np, 1), jnp.float32),    # running max
            pltpu.VMEM((Np, 1), jnp.float32),    # running sum-exp
        ],
        compiler_params=pltpu.CompilerParams(
            dimension_semantics=("arbitrary",),
            vmem_limit_bytes=_VMEM_LIMIT),
        cost_estimate=pl.CostEstimate(
            flops=int(2 * Np * Dp * nid_pad),
            transcendentals=int(Np * nid_pad),
            bytes_accessed=int(2 * (Np * Dp + Dp * nid_pad)
                               + 4 * (nid_pad + 4 * Np))),
    )(xn_bf16, valid, tgt_logit, w_t_pad, b_pad)


# --------------------------- JAX glue ---------------------------------------

def tranpose_and_gather_feat(feat, ind):
    # feat: (B, C, H, W) NCHW ; ind: (B, K) flat spatial indices.
    # Gather before transposing: only the tiny (B, C, K) result is transposed.
    B, C, H, W = feat.shape
    feat = feat.reshape(B, C, H * W)
    g = jnp.take_along_axis(feat, ind[:, None, :].astype(jnp.int32), axis=2)
    return jnp.transpose(g, (0, 2, 1))            # (B, K, C)


class MotLossJAX:
    def __init__(self, opt, key):
        self.opt = opt
        self.emb_dim = opt['reid_dim']
        self.nID = opt['nID']
        k1, k2 = jax.random.split(key)
        # deterministic synthetic init of nn.Linear(emb_dim, nID)
        self.classifier_w = 0.01 * jax.random.normal(
            k1, (self.nID, self.emb_dim), jnp.float32)
        self.classifier_b = 0.01 * jax.random.normal(
            k2, (self.nID,), jnp.float32)
        self.emb_scale = math.sqrt(2.0) * math.log(self.nID - 1)
        self.s_det = -1.85 * jnp.ones((1,), jnp.float32)
        self.s_id = -1.05 * jnp.ones((1,), jnp.float32)
        # TODO(synk): self.wid is only used for id_loss=='cross'; unused here.

        # Pre-transposed / padded classifier params for the streaming CE kernel.
        # Weight stored bf16 (full MXU rate, half the streamed bytes); bias f32.
        self.d_pad = _round_up(self.emb_dim, 128)
        self.class_tile = min(512, _round_up(self.nID, 128))
        self.nid_pad = _round_up(self.nID, self.class_tile)
        w_t = jnp.zeros((self.d_pad, self.nid_pad), jnp.float32)
        w_t = w_t.at[:self.emb_dim, :self.nID].set(self.classifier_w.T)
        self.classifier_w_t_pad = w_t.astype(jnp.bfloat16)
        b = jnp.full((1, self.nid_pad), -1e30, jnp.float32)  # padded classes -> -inf
        b = b.at[0, :self.nID].set(self.classifier_b)
        self.classifier_b_pad = b

    def __call__(self, outputs, batch):
        opt = self.opt
        hm_loss = jnp.float32(0.0)
        wh_loss = jnp.float32(0.0)
        off_loss = jnp.float32(0.0)
        id_loss = jnp.float32(0.0)

        for s in range(opt['num_stacks']):
            output = outputs[s]
            B_, K_ = batch['ind'].shape

            # ---- fused: heatmap focal + wh/offset masked-L1 sums ------------
            do_wh = opt['wh_weight'] > 0
            do_off = opt['reg_offset'] and opt['off_weight'] > 0
            if do_wh:
                pred_wh = tranpose_and_gather_feat(output['wh'], batch['ind'])
                tgt_wh = batch['wh']
            else:
                pred_wh = tgt_wh = jnp.zeros((B_, K_, 2), jnp.float32)
            if do_off:
                pred_reg = tranpose_and_gather_feat(output['reg'], batch['ind'])
                tgt_reg = batch['reg']
            else:
                pred_reg = tgt_reg = jnp.zeros((B_, K_, 2), jnp.float32)
            mask_exp = jnp.broadcast_to(
                batch['reg_mask'].astype(jnp.float32)[:, :, None],
                pred_wh.shape)

            s5 = focal_and_reg_sums(output['hm'], batch['hm'],
                                    pred_wh, tgt_wh, pred_reg, tgt_reg,
                                    mask_exp)
            focal = -s5[0] / jnp.maximum(s5[1], 1.0)
            hm_loss = hm_loss + focal / opt['num_stacks']
            if do_wh:
                wh_loss = wh_loss + (s5[2] / (s5[4] + 1e-4)) / opt['num_stacks']
            if do_off:
                off_loss = off_loss + (s5[3] / (s5[4] + 1e-4)) / opt['num_stacks']

            # ---- ID loss: normalize (JAX) + streaming classifier CE --------
            if opt['id_weight'] > 0:
                id_head = tranpose_and_gather_feat(output['id'], batch['ind'])
                N = B_ * K_
                feat = id_head.reshape(N, self.emb_dim).astype(jnp.float32)
                ids = batch['ids'].reshape(N).astype(jnp.int32)
                # CrossEntropyLoss(ignore_index=-1) applied after reg_mask>0 filter
                valid = ((batch['reg_mask'].reshape(N) > 0) &
                         (ids != -1)).astype(jnp.float32)

                # F.normalize * emb_scale (O(N*D), plain JAX)
                nrm = jnp.sqrt(jnp.sum(feat * feat, axis=-1, keepdims=True))
                xn = self.emb_scale * feat / jnp.maximum(nrm, 1e-12)

                # target logit hoisted out of the class-tile loop (f32)
                ids_c = jnp.maximum(ids, 0)          # ids==-1 rows masked by valid
                w_tgt = self.classifier_w[ids_c]     # (N, emb_dim)
                tl = jnp.sum(xn * w_tgt, axis=-1) + self.classifier_b[ids_c]

                Np = _round_up(max(N, 16), 16)
                xn_p = jnp.zeros((Np, self.d_pad), jnp.float32)
                xn_p = xn_p.at[:N, :self.emb_dim].set(xn)
                valid_p = jnp.zeros((Np, 1), jnp.float32).at[:N, 0].set(valid)
                tl_p = jnp.zeros((Np, 1), jnp.float32).at[:N, 0].set(tl)

                r = id_ce_sums(xn_p.astype(jnp.bfloat16), valid_p, tl_p,
                               self.classifier_w_t_pad, self.classifier_b_pad,
                               self.class_tile)
                denom = jnp.where(r[1] > 0, r[1], 1.0)   # guard: no valid ids
                id_loss = id_loss + r[0] / denom

        det_loss = (opt['hm_weight'] * hm_loss +
                    opt['wh_weight'] * wh_loss +
                    opt['off_weight'] * off_loss)
        if opt['multi_loss'] == 'uncertainty':
            loss = (jnp.exp(-self.s_det) * det_loss +
                    jnp.exp(-self.s_id) * id_loss +
                    (self.s_det + self.s_id))
            loss = loss * 0.5
        else:
            loss = det_loss + 0.1 * id_loss
        loss_stats = {'loss': loss, 'hm_loss': hm_loss, 'wh_loss': wh_loss,
                      'off_loss': off_loss, 'id_loss': id_loss}
        return loss, loss_stats


# --------------------------- pure-JAX reference (for checking) --------------

def reference_forward(model, outputs, batch, opt):
    output = outputs[0]
    p = jnp.clip(jax.nn.sigmoid(output['hm']), 1e-4, 1.0 - 1e-4)
    gt = batch['hm']
    pos = (gt == 1.0).astype(jnp.float32)
    neg = (gt < 1.0).astype(jnp.float32)
    pos_loss = jnp.sum(jnp.log(p) * jnp.square(1 - p) * pos)
    neg_loss = jnp.sum(jnp.log(1 - p) * jnp.square(p) * jnp.power(1 - gt, 4) * neg)
    num_pos = jnp.sum(pos)
    hm_loss = jnp.where(num_pos == 0, -neg_loss,
                        -(pos_loss + neg_loss) / jnp.maximum(num_pos, 1.0))

    def regl1(out, mask, ind, target):
        pred = tranpose_and_gather_feat(out, ind)
        m = mask.astype(jnp.float32)[:, :, None] * jnp.ones_like(pred)
        return jnp.sum(jnp.abs(pred * m - target * m)) / (jnp.sum(m) + 1e-4)

    wh_loss = regl1(output['wh'], batch['reg_mask'], batch['ind'], batch['wh'])
    off_loss = regl1(output['reg'], batch['reg_mask'], batch['ind'], batch['reg'])

    id_head = tranpose_and_gather_feat(output['id'], batch['ind'])
    id_head = id_head.reshape(-1, model.emb_dim)
    nrm = jnp.sqrt(jnp.sum(id_head ** 2, -1, keepdims=True))
    xh = model.emb_scale * id_head / jnp.maximum(nrm, 1e-12)
    logits = xh @ model.classifier_w.T + model.classifier_b
    logp = jax.nn.log_softmax(logits, -1)
    ids = batch['ids'].reshape(-1).astype(jnp.int32)
    valid = ((batch['reg_mask'].reshape(-1) > 0) & (ids != -1)).astype(jnp.float32)
    per = -jnp.take_along_axis(logp, jnp.maximum(ids, 0)[:, None], 1)[:, 0]
    id_loss = jnp.sum(per * valid) / jnp.sum(valid)

    det = (opt['hm_weight'] * hm_loss + opt['wh_weight'] * wh_loss +
           opt['off_weight'] * off_loss)
    loss = 0.5 * (jnp.exp(-model.s_det) * det + jnp.exp(-model.s_id) * id_loss +
                  (model.s_det + model.s_id))
    return loss


# --------------------------- main --------------------------------------------

if __name__ == "__main__":
    B, K, H, W = 2, 8, 16, 16
    reid_dim, nID = 32, 64
    opt = dict(num_stacks=1, mse_loss=False, reg_loss='l1', dense_wh=False,
               norm_wh=False, cat_spec_wh=False, hm_weight=1.0, wh_weight=0.1,
               off_weight=1.0, id_weight=1.0, reg_offset=True, ext_offset='',
               id_loss='ce', multi_loss='uncertainty',
               reid_dim=reid_dim, nID=nID)

    key = jax.random.PRNGKey(0)
    keys = jax.random.split(key, 12)

    # network outputs (one stack), NCHW
    out_hm = jax.random.normal(keys[0], (B, 1, H, W), jnp.float32)
    out_wh = jax.random.normal(keys[1], (B, 2, H, W), jnp.float32)
    out_reg = jax.random.normal(keys[2], (B, 2, H, W), jnp.float32)
    out_id = jax.random.normal(keys[3], (B, reid_dim, H, W), jnp.float32)
    outputs = [{'hm': out_hm, 'wh': out_wh, 'reg': out_reg, 'id': out_id}]

    # batch / targets
    ind = jax.random.randint(keys[5], (B, K), 0, H * W).astype(jnp.int32)
    gt_hm = jax.random.uniform(keys[4], (B, 1, H, W), jnp.float32, 0.0, 0.95)
    gt_flat = gt_hm.reshape(B, H * W)
    gt_flat = gt_flat.at[jnp.arange(B)[:, None], ind].set(1.0)  # exact peaks
    gt_hm = gt_flat.reshape(B, 1, H, W)

    reg_mask = jnp.zeros((B, K), jnp.float32).at[:, :5].set(1.0)
    wh_t = jax.random.uniform(keys[6], (B, K, 2), jnp.float32, 0.0, 4.0)
    reg_t = jax.random.uniform(keys[7], (B, K, 2), jnp.float32, 0.0, 1.0)
    ids = jax.random.randint(keys[8], (B, K), 0, nID).astype(jnp.int32)
    ids = ids.at[0, 2].set(-1)   # exercise ignore_index=-1

    batch = {'hm': gt_hm, 'reg_mask': reg_mask, 'ind': ind,
             'wh': wh_t, 'reg': reg_t, 'ids': ids}

    model = MotLossJAX(opt, keys[10])

    loss, stats = model(outputs, batch)
    loss = jax.block_until_ready(loss)

    ref = jax.block_until_ready(reference_forward(model, outputs, batch, opt))
    np.testing.assert_allclose(np.asarray(loss), np.asarray(ref),
                               rtol=2e-3, atol=2e-4)

    print("KERNEL_OK")
</pallas_src>

<mosaic_0001>
module attributes {stable_mosaic.version = 11 : i64} {
  func.func @_focal_reg_kernel(%arg0: i32, %arg1: memref<1x512xf32, #tpu.memory_space<vmem>>, %arg2: memref<1x512xf32, #tpu.memory_space<vmem>>, %arg3: memref<1x128xf32, #tpu.memory_space<vmem>>, %arg4: memref<1x128xf32, #tpu.memory_space<vmem>>, %arg5: memref<1x128xf32, #tpu.memory_space<vmem>>, %arg6: memref<1x128xf32, #tpu.memory_space<vmem>>, %arg7: memref<1x128xf32, #tpu.memory_space<vmem>>, %arg8: memref<5xf32, #tpu.memory_space<smem>>) attributes {dimension_semantics = [#tpu.dimension_semantics<arbitrary>], iteration_bounds = array<i64: 1>, scalar_prefetch = 0 : i64, scratch_operands = 0 : i64, tpu.core_type = #tpu.core_type<tc>, window_params = [{transform_indices = @transform_0, window_bounds = array<i64: 1, 512>}, {transform_indices = @transform_1, window_bounds = array<i64: 1, 512>}, {pipeline_mode = #tpu.pipeline_mode<synchronous>, transform_indices = @transform_2, window_bounds = array<i64: 1, 128>}, {pipeline_mode = #tpu.pipeline_mode<synchronous>, transform_indices = @transform_3, window_bounds = array<i64: 1, 128>}, {pipeline_mode = #tpu.pipeline_mode<synchronous>, transform_indices = @transform_4, window_bounds = array<i64: 1, 128>}, {pipeline_mode = #tpu.pipeline_mode<synchronous>, transform_indices = @transform_5, window_bounds = array<i64: 1, 128>}, {pipeline_mode = #tpu.pipeline_mode<synchronous>, transform_indices = @transform_6, window_bounds = array<i64: 1, 128>}, {transform_indices = @transform_7, window_bounds = array<i64: 5>}]} {
    %c0_i32 = arith.constant 0 : i32
    %0 = arith.cmpi eq, %arg0, %c0_i32 : i32
    %1 = arith.extui %0 : i1 to i32
    %c0_i32_0 = arith.constant 0 : i32
    %2 = arith.cmpi ne, %1, %c0_i32_0 : i32
    scf.if %2 {
      %c0_26 = arith.constant 0 : index
      %c0_27 = arith.constant 0 : index
      %76 = vector.load %arg7[%c0_26, %c0_27] : memref<1x128xf32, #tpu.memory_space<vmem>>, vector<1x128xf32>
      %cst_28 = arith.constant 0.000000e+00 : f32
      %c0_29 = arith.constant 0 : index
      %77 = memref.load %arg8[%c0_29] : memref<5xf32, #tpu.memory_space<smem>>
      memref.store %cst_28, %arg8[%c0_29] : memref<5xf32, #tpu.memory_space<smem>>
      %cst_30 = arith.constant 0.000000e+00 : f32
      %c1_31 = arith.constant 1 : index
      %78 = memref.load %arg8[%c1_31] : memref<5xf32, #tpu.memory_space<smem>>
      memref.store %cst_30, %arg8[%c1_31] : memref<5xf32, #tpu.memory_space<smem>>
      %c0_32 = arith.constant 0 : index
      %c0_33 = arith.constant 0 : index
      %79 = vector.load %arg3[%c0_32, %c0_33] : memref<1x128xf32, #tpu.memory_space<vmem>>, vector<1x128xf32>
      %c0_34 = arith.constant 0 : index
      %c0_35 = arith.constant 0 : index
      %80 = vector.load %arg4[%c0_34, %c0_35] : memref<1x128xf32, #tpu.memory_space<vmem>>, vector<1x128xf32>
      %81 = arith.subf %79, %80 : vector<1x128xf32>
      %82 = math.absf %81 : vector<1x128xf32>
      %83 = arith.mulf %76, %82 : vector<1x128xf32>
      %84 = vector.shape_cast %83 : vector<1x128xf32> to vector<1x1x128xf32>
      %cst_36 = arith.constant dense<0.000000e+00> : vector<1xf32>
      %85 = vector.multi_reduction <add>, %84, %cst_36 [1, 2] : vector<1x1x128xf32> to vector<1xf32>
      %86 = vector.shape_cast %85 : vector<1xf32> to vector<1x1x1xf32>
      %87 = vector.extract %86[0, 0, 0] : f32 from vector<1x1x1xf32>
      %c2 = arith.constant 2 : index
      %88 = memref.load %arg8[%c2] : memref<5xf32, #tpu.memory_space<smem>>
      memref.store %87, %arg8[%c2] : memref<5xf32, #tpu.memory_space<smem>>
      %c0_37 = arith.constant 0 : index
      %c0_38 = arith.constant 0 : index
      %89 = vector.load %arg5[%c0_37, %c0_38] : memref<1x128xf32, #tpu.memory_space<vmem>>, vector<1x128xf32>
      %c0_39 = arith.constant 0 : index
      %c0_40 = arith.constant 0 : index
      %90 = vector.load %arg6[%c0_39, %c0_40] : memref<1x128xf32, #tpu.memory_space<vmem>>, vector<1x128xf32>
      %91 = arith.subf %89, %90 : vector<1x128xf32>
      %92 = math.absf %91 : vector<1x128xf32>
      %93 = arith.mulf %76, %92 : vector<1x128xf32>
      %94 = vector.shape_cast %93 : vector<1x128xf32> to vector<1x1x128xf32>
      %cst_41 = arith.constant dense<0.000000e+00> : vector<1xf32>
      %95 = vector.multi_reduction <add>, %94, %cst_41 [1, 2] : vector<1x1x128xf32> to vector<1xf32>
      %96 = vector.shape_cast %95 : vector<1xf32> to vector<1x1x1xf32>
      %97 = vector.extract %96[0, 0, 0] : f32 from vector<1x1x1xf32>
      %c3 = arith.constant 3 : index
      %98 = memref.load %arg8[%c3] : memref<5xf32, #tpu.memory_space<smem>>
      memref.store %97, %arg8[%c3] : memref<5xf32, #tpu.memory_space<smem>>
      %99 = vector.shape_cast %76 : vector<1x128xf32> to vector<1x1x128xf32>
      %cst_42 = arith.constant dense<0.000000e+00> : vector<1xf32>
      %100 = vector.multi_reduction <add>, %99, %cst_42 [1, 2] : vector<1x1x128xf32> to vector<1xf32>
      %101 = vector.shape_cast %100 : vector<1xf32> to vector<1x1x1xf32>
      %102 = vector.extract %101[0, 0, 0] : f32 from vector<1x1x1xf32>
      %c4 = arith.constant 4 : index
      %103 = memref.load %arg8[%c4] : memref<5xf32, #tpu.memory_space<smem>>
      memref.store %102, %arg8[%c4] : memref<5xf32, #tpu.memory_space<smem>>
    } else {
    }
    %c0 = arith.constant 0 : index
    %c0_1 = arith.constant 0 : index
    %3 = vector.load %arg1[%c0, %c0_1] : memref<1x512xf32, #tpu.memory_space<vmem>>, vector<1x512xf32>
    %c0_2 = arith.constant 0 : index
    %c0_3 = arith.constant 0 : index
    %4 = vector.load %arg2[%c0_2, %c0_3] : memref<1x512xf32, #tpu.memory_space<vmem>>, vector<1x512xf32>
    %5 = math.absf %3 : vector<1x512xf32>
    %cst = arith.constant 0.000000e+00 : f32
    %6 = vector.broadcast %cst : f32 to vector<1x512xf32>
    %7 = arith.subf %6, %5 : vector<1x512xf32>
    %8 = math.exp %7 : vector<1x512xf32>
    %cst_4 = arith.constant 1.000000e+00 : f32
    %9 = vector.broadcast %cst_4 : f32 to vector<1x512xf32>
    %10 = arith.addf %9, %8 : vector<1x512xf32>
    %11 = math.log %10 : vector<1x512xf32>
    %cst_5 = arith.constant 1.000000e+00 : f32
    %12 = vector.broadcast %cst_5 : f32 to vector<1x512xf32>
    %13 = arith.addf %12, %8 : vector<1x512xf32>
    %cst_6 = arith.constant 1.000000e+00 : f32
    %14 = vector.broadcast %cst_6 : f32 to vector<1x512xf32>
    %15 = arith.divf %14, %13 : vector<1x512xf32>
    %cst_7 = arith.constant 0.000000e+00 : f32
    %16 = vector.broadcast %cst_7 : f32 to vector<1x512xf32>
    %17 = arith.cmpf oge, %3, %16 : vector<1x512xf32>
    %18 = arith.mulf %8, %15 : vector<1x512xf32>
    %19 = arith.select %17, %15, %18 : vector<1x512xi1>, vector<1x512xf32>
    %cst_8 = arith.constant 9.99999974E-5 : f32
    %cst_9 = arith.constant 0.999899983 : f32
    %20 = vector.broadcast %cst_8 : f32 to vector<1x512xf32>
    %21 = arith.maximumf %20, %19 : vector<1x512xf32>
    %22 = vector.broadcast %cst_9 : f32 to vector<1x512xf32>
    %23 = arith.minimumf %22, %21 : vector<1x512xf32>
    %cst_10 = arith.constant 1.000000e+00 : f32
    %24 = vector.broadcast %cst_10 : f32 to vector<1x512xf32>
    %25 = arith.subf %24, %23 : vector<1x512xf32>
    %cst_11 = arith.constant 0.000000e+00 : f32
    %26 = vector.broadcast %cst_11 : f32 to vector<1x512xf32>
    %27 = arith.minimumf %3, %26 : vector<1x512xf32>
    %28 = arith.subf %27, %11 : vector<1x512xf32>
    %cst_12 = arith.constant -9.21034049 : f32
    %cst_13 = arith.constant -1.000050e-04 : f32
    %29 = vector.broadcast %cst_12 : f32 to vector<1x512xf32>
    %30 = arith.maximumf %29, %28 : vector<1x512xf32>
    %31 = vector.broadcast %cst_13 : f32 to vector<1x512xf32>
    %32 = arith.minimumf %31, %30 : vector<1x512xf32>
    %cst_14 = arith.constant 0.000000e+00 : f32
    %33 = vector.broadcast %cst_14 : f32 to vector<1x512xf32>
    %34 = arith.maximumf %3, %33 : vector<1x512xf32>
    %cst_15 = arith.constant 0.000000e+00 : f32
    %35 = vector.broadcast %cst_15 : f32 to vector<1x512xf32>
    %36 = arith.subf %35, %34 : vector<1x512xf32>
    %37 = arith.subf %36, %11 : vector<1x512xf32>
    %cst_16 = arith.constant -9.21034049 : f32
    %cst_17 = arith.constant -1.000050e-04 : f32
    %38 = vector.broadcast %cst_16 : f32 to vector<1x512xf32>
    %39 = arith.maximumf %38, %37 : vector<1x512xf32>
    %40 = vector.broadcast %cst_17 : f32 to vector<1x512xf32>
    %41 = arith.minimumf %40, %39 : vector<1x512xf32>
    %cst_18 = arith.constant 1.000000e+00 : f32
    %42 = vector.broadcast %cst_18 : f32 to vector<1x512xf32>
    %43 = arith.cmpf oeq, %4, %42 : vector<1x512xf32>
    %44 = arith.extui %43 : vector<1x512xi1> to vector<1x512xi32>
    %45 = arith.sitofp %44 : vector<1x512xi32> to vector<1x512xf32>
    %cst_19 = arith.constant 1.000000e+00 : f32
    %46 = vector.broadcast %cst_19 : f32 to vector<1x512xf32>
    %47 = arith.cmpf olt, %4, %46 : vector<1x512xf32>
    %48 = arith.extui %47 : vector<1x512xi1> to vector<1x512xi32>
    %49 = arith.sitofp %48 : vector<1x512xi32> to vector<1x512xf32>
    %cst_20 = arith.constant 1.000000e+00 : f32
    %50 = vector.broadcast %cst_20 : f32 to vector<1x512xf32>
    %51 = arith.subf %50, %4 : vector<1x512xf32>
    %52 = arith.mulf %51, %51 : vector<1x512xf32>
    %53 = arith.mulf %52, %52 : vector<1x512xf32>
    %54 = arith.mulf %25, %25 : vector<1x512xf32>
    %55 = arith.mulf %32, %54 : vector<1x512xf32>
    %56 = arith.mulf %55, %45 : vector<1x512xf32>
    %57 = arith.mulf %23, %23 : vector<1x512xf32>
    %58 = arith.mulf %41, %57 : vector<1x512xf32>
    %59 = arith.mulf %58, %53 : vector<1x512xf32>
    %60 = arith.mulf %59, %49 : vector<1x512xf32>
    %c0_21 = arith.constant 0 : index
    %61 = memref.load %arg8[%c0_21] : memref<5xf32, #tpu.memory_space<smem>>
    %62 = arith.addf %56, %60 : vector<1x512xf32>
    %63 = vector.shape_cast %62 : vector<1x512xf32> to vector<1x1x512xf32>
    %cst_22 = arith.constant dense<0.000000e+00> : vector<1xf32>
    %64 = vector.multi_reduction <add>, %63, %cst_22 [1, 2] : vector<1x1x512xf32> to vector<1xf32>
    %65 = vector.shape_cast %64 : vector<1xf32> to vector<1x1x1xf32>
    %66 = vector.extract %65[0, 0, 0] : f32 from vector<1x1x1xf32>
    %67 = arith.addf %61, %66 : f32
    %c0_23 = arith.constant 0 : index
    %68 = memref.load %arg8[%c0_23] : memref<5xf32, #tpu.memory_space<smem>>
    memref.store %67, %arg8[%c0_23] : memref<5xf32, #tpu.memory_space<smem>>
    %c1 = arith.constant 1 : index
    %69 = memref.load %arg8[%c1] : memref<5xf32, #tpu.memory_space<smem>>
    %70 = vector.shape_cast %45 : vector<1x512xf32> to vector<1x1x512xf32>
    %cst_24 = arith.constant dense<0.000000e+00> : vector<1xf32>
    %71 = vector.multi_reduction <add>, %70, %cst_24 [1, 2] : vector<1x1x512xf32> to vector<1xf32>
    %72 = vector.shape_cast %71 : vector<1xf32> to vector<1x1x1xf32>
    %73 = vector.extract %72[0, 0, 0] : f32 from vector<1x1x1xf32>
    %74 = arith.addf %69, %73 : f32
    %c1_25 = arith.constant 1 : index
    %75 = memref.load %arg8[%c1_25] : memref<5xf32, #tpu.memory_space<smem>>
    memref.store %74, %arg8[%c1_25] : memref<5xf32, #tpu.memory_space<smem>>
    return
  }
  func.func @transform_0(%arg0: i32) -> (i32, i32) {
    %c0_i32 = arith.constant 0 : i32
    %c0_i32_0 = arith.constant 0 : i32
    return %arg0, %c0_i32 : i32, i32
  }
  func.func @transform_1(%arg0: i32) -> (i32, i32) {
    %c0_i32 = arith.constant 0 : i32
    %c0_i32_0 = arith.constant 0 : i32
    return %arg0, %c0_i32 : i32, i32
  }
  func.func @transform_2(%arg0: i32) -> (i32, i32) {
    %c0_i32 = arith.constant 0 : i32
    %c0_i32_0 = arith.constant 0 : i32
    %c0_i32_1 = arith.constant 0 : i32
    return %c0_i32, %c0_i32_0 : i32, i32
  }
  func.func @transform_3(%arg0: i32) -> (i32, i32) {
    %c0_i32 = arith.constant 0 : i32
    %c0_i32_0 = arith.constant 0 : i32
    %c0_i32_1 = arith.constant 0 : i32
    return %c0_i32, %c0_i32_0 : i32, i32
  }
  func.func @transform_4(%arg0: i32) -> (i32, i32) {
    %c0_i32 = arith.constant 0 : i32
    %c0_i32_0 = arith.constant 0 : i32
    %c0_i32_1 = arith.constant 0 : i32
    return %c0_i32, %c0_i32_0 : i32, i32
  }
  func.func @transform_5(%arg0: i32) -> (i32, i32) {
    %c0_i32 = arith.constant 0 : i32
    %c0_i32_0 = arith.constant 0 : i32
    %c0_i32_1 = arith.constant 0 : i32
    return %c0_i32, %c0_i32_0 : i32, i32
  }
  func.func @transform_6(%arg0: i32) -> (i32, i32) {
    %c0_i32 = arith.constant 0 : i32
    %c0_i32_0 = arith.constant 0 : i32
    %c0_i32_1 = arith.constant 0 : i32
    return %c0_i32, %c0_i32_0 : i32, i32
  }
  func.func @transform_7(%arg0: i32) -> i32 {
    %c0_i32 = arith.constant 0 : i32
    %c0_i32_0 = arith.constant 0 : i32
    return %c0_i32 : i32
  }
}

</mosaic_0001>

<bundles_post_ra>
// kernel: tpu_custom_call.1
= control target key start
LH: loop header
LB: loop body
LE: loop exit
PB: predicated region body
PF: predicated region fallthrough
CT: control target
= control target key end

     0   :  { %12 = vsyncpa [#allocation3], 0  ;;  %s423_s0 = inlined_call_operand.hbm [shape: f32[1,512], index: 0, kind: input, shape index: {}]   ;;  %s424_s1 = inlined_call_operand.hbm [shape: f32[1,512], index: 1, kind: input, shape index: {}]   ;;  %s425_s2 = inlined_call_operand.vmem [shape: f32[1,128], index: 2, kind: input, shape index: {}]   ;;  %s426_s3 = inlined_call_operand.vmem [shape: f32[1,128], index: 3, kind: input, shape index: {}]   ;;  %s427_s4 = inlined_call_operand.vmem [shape: f32[1,128], index: 4, kind: input, shape index: {}]   ;;  %s428_s5 = inlined_call_operand.vmem [shape: f32[1,128], index: 5, kind: input, shape index: {}]   ;;  %s429_s6 = inlined_call_operand.vmem [shape: f32[1,128], index: 6, kind: input, shape index: {}]   ;;  %s430_s7 = inlined_call_operand.hbm [shape: f32[5], index: 7, kind: output, shape index: {}]  }
   0x1   :  { %13 = vsyncpa [#allocation6], 0 }
   0x2   :  { %14 = vsyncpa [#allocation4], 0  ;;  %s326_s24 = smov [#allocation2]   ;;  %s327_s26 = smov [#allocation5]  }
   0x3   :  { %s21_s25 = sshll.u32 %s326_s24, 4  ;;  %s31_s27 = sshll.u32 %s327_s26, 4  ;;  %s22_s25 = int_to_ptr.vmem [resolvable:$true] %s21_s25  ;;  %s32_s27 = int_to_ptr.vmem [resolvable:$true] %s31_s27 }
   0x4   :  { %s280_s28 = scalar_lea.vmem %s22_s25, 64  ;;  %p285_p1 = scmp.lt.s32.totalorder %s22_s25, %s22_s25 }
   0x5   :  { %p281_p0 = scmp.ne.s32.totalorder %s22_s25, %s280_s28  ;;  %p286_p2 = scmp.lt.s32.totalorder %s280_s28, %s280_s28 }
   0x7   :  { %p287_p3 = por %p286_p2, %p285_p1 }
   0x9   :  { %p288_p4 = pnand %p287_p3, %p281_p0 }
   0xb   :  { %291 = shalt.err (!%p288_p4)
}
   0xc   :  { %24 = dma.hbm_to_vmem [thread:$0]  %s423_s0, 64, %s22_s25, [#allocation3]  }
   0xd   :  { %s300_s8 = scalar_lea.vmem %s32_s27, 64  ;;  %p305_p6 = scmp.lt.s32.totalorder %s32_s27, %s32_s27 }
   0xe   :  { %p301_p5 = scmp.ne.s32.totalorder %s32_s27, %s300_s8  ;;  %p306_p7 = scmp.lt.s32.totalorder %s300_s8, %s300_s8 }
  0x10   :  { %p307_p8 = por %p306_p7, %p305_p6 }
  0x12   :  { %p308_p9 = pnand %p307_p8, %p301_p5 }
  0x14   :  { %311 = shalt.err (!%p308_p9)
}
  0x15   :  { %34 = dma.hbm_to_vmem [thread:$0]  %s424_s1, 64, %s32_s27, [#allocation6]  }
  0x16   :  { %320 = dma.done.wait [#allocation3], 64  }
  0x17   :  { %321 = vsyncadd [#allocation3], 4294967232 }
  0x18   :  { %322 = dma.done.wait [#allocation6], 64  }
  0x19   :  { %323 = vsyncadd [#allocation6], 4294967232  ;;  %v152_v0 = vlaneseq  ;;  %vm65_vm0 = vcmask 1040384   ;;  %v55_v2 = vld [vmem:[%s429_s6] sm:$0x1]  ;;  %v328_v21 = vmov 0.0  }
  0x1a   :  { %v60_v3 = vld [vmem:[%s425_s2] sm:$0x1]  ;;  %v95_v6 = vsel %vm65_vm0, %v55_v2, 0.0  ;;  %v108_v15 = vld [vmem:[#allocation5] sm:$0xf]  ;;  %s329_s19 = smov [#allocation7]  }
  0x1b   :  { %v376_v1 = vshrl.u32 %v152_v0, 7  ;;  %v61_v4 = vld [vmem:[%s426_s3] sm:$0x1]  ;;  %96 = vadd.xlane.f32.xlu1 %v95_v6  ;;  %vm133_vm1 = vcmp.eq.f32.partialorder %v108_v15, 1.0  ;;  %v139_v46 = vsub.f32 1.0, %v108_v15  ;;  %vm136_vm3 = vcmp.lt.f32.partialorder %v108_v15, 1.0 }
  0x1c   :  { %v62_v5 = vsub.f32 %v60_v3, %v61_v4  ;;  %v78_v7 = vld [vmem:[%s427_s4] sm:$0x1]  ;;  %v248_v22 = vsel %vm133_vm1, 1.0, %v328_v21  ;;  %v249_v63 = vsel %vm136_vm3, 1.0, %v328_v21 }
  0x1d   :  { %v79_v8 = vld [vmem:[%s428_s5] sm:$0x1]  ;;  %v154_v11 = vsub.s32 0, %v376_v1  ;;  %v158_v12 = vsub.s32 1, %v376_v1  ;;  %v162_v13 = vsub.s32 2, %v376_v1  ;;  %v166_v18 = vsub.s32 3, %v376_v1 }
  0x1e   :  { %v80_v9 = vsub.f32 %v78_v7, %v79_v8  ;;  %v107_v10 = vld [vmem:[#allocation2] sm:$0xf]  ;;  %v63_v14 = vand.u32 2147483647, %v62_v5  ;;  %v140_v53 = vmul.f32 %v139_v46, %v139_v46 }
  0x1f   :  { %v109_v16 = vand.u32 2147483647, %v107_v10  ;;  %v197_v24 = vrot.slane %v248_v22, %v154_v11  ;;  %v201_v27 = vrot.slane %v248_v22, %v158_v12  ;;  %v205_v28 = vrot.slane %v248_v22, %v162_v13 }
  0x20   :  { %v81_v17 = vand.u32 2147483647, %v80_v9  ;;  %v64_v19 = vmul.f32 %v63_v14, %v55_v2  ;;  %v209_v29 = vrot.slane %v248_v22, %v166_v18  ;;  %v128_v40 = vmax.f32 %v107_v10, 0.0 }
  0x21   :  { %v110_v20 = vsub.f32 0.0, %v109_v16  ;;  %v214_v30 = vsel %vm65_vm0, %v197_v24, 0.0  ;;  %v215_v32 = vsel %vm65_vm0, %v201_v27, 0.0  ;;  %v217_v33 = vsel %vm65_vm0, %v205_v28, 0.0 }
  0x22   :  { %v82_v23 = vmul.f32 %v81_v17, %v55_v2  ;;  %v66_v25 = vsel %vm65_vm0, %v64_v19, 0.0  ;;  %v216_v34 = vadd.f32 %v215_v32, %v214_v30  ;;  %v219_v35 = vsel %vm65_vm0, %v209_v29, 0.0 }
  0x23   :  { %v111_v26 = vmul.f32 1.442695, %v110_v20  ;;  %67 = vadd.xlane.f32.xlu0 %v66_v25  ;;  %v129_v41 = vsub.f32 0.0, %v128_v40  ;;  %v124_v42 = vmin.f32 %v107_v10, 0.0  ;;  %vm118_vm2 = vcmp.ge.f32.partialorder %v107_v10, 0.0 }
  0x24   :  { %v83_v31 = vsel %vm65_vm0, %v82_v23, 0.0  ;;  %v218_v36 = vadd.f32 %v217_v33, %v216_v34  ;;  %v141_v57 = vmul.f32 %v140_v53, %v140_v53 }
  0x25   :  { %266 = vpow2.f32 %v111_v26 }
  0x26   :  { %v220_v37 = vadd.f32 %v219_v35, %v218_v36 }
  0x27   :  { %84 = vadd.xlane.f32.xlu0 %v83_v31 }
  0x2b   :  { %221 = vadd.xlane.f32.xlu0 %v220_v37 }
  0x32   :  { %v267_v38 = vpop.eup %266 }
  0x33   :  { %v113_v39 = vadd.f32 1.0, %v267_v38 }
  0x35   :  { %268 = vlog2.f32 %v113_v39 }
  0x36   :  { %270 = vrcp.f32 %v113_v39 }
  0x42   :  { %v269_v43 = vpop.eup %268 }
  0x43   :  { %v271_v44 = vpop.eup %270  ;;  %v115_v45 = vmul.f32 0.6931472, %v269_v43 }
  0x44   :  { %v119_v47 = vmul.f32 %v271_v44, %v267_v38 }
  0x45   :  { %v130_v48 = vsub.f32 %v129_v41, %v115_v45  ;;  %v125_v49 = vsub.f32 %v124_v42, %v115_v45 }
  0x46   :  { %v120_v50 = vsel %vm118_vm2, %v271_v44, %v119_v47 }
  0x47   :  { %v121_v51 = vmax.f32 %v120_v50, 0.0001  ;;  %v131_v52 = vmax.f32 %v130_v48, -9.2103405  ;;  %v126_v54 = vmax.f32 %v125_v49, -9.2103405 }
  0x49   :  { %v122_v55 = vmin.f32 %v121_v51, 0.9999  ;;  %v132_v56 = vmin.f32 %v131_v52, -0.000100005  ;;  %v127_v60 = vmin.f32 %v126_v54, -0.000100005 }
  0x4b   :  { %v145_v58 = vmul.f32 %v122_v55, %v122_v55  ;;  %v123_v59 = vsub.f32 1.0, %v122_v55 }
  0x4d   :  { %v146_v61 = vmul.f32 %v145_v58, %v132_v56  ;;  %v142_v62 = vmul.f32 %v123_v59, %v123_v59 }
  0x4f   :  { %v147_v0 = vmul.f32 %v146_v61, %v141_v57  ;;  %v143_v2 = vmul.f32 %v142_v62, %v127_v60 }
  0x51   :  { %v148_v3 = vmul.f32 %v249_v63, %v147_v0  ;;  %v144_v4 = vmul.f32 %v248_v22, %v143_v2 }
  0x53   :  { %v150_v5 = vadd.f32 %v148_v3, %v144_v4 }
  0x55   :  { %v155_v6 = vrot.slane %v150_v5, %v154_v11  ;;  %v159_v7 = vrot.slane %v150_v5, %v158_v12  ;;  %v163_v8 = vrot.slane %v150_v5, %v162_v13  ;;  %v167_v9 = vrot.slane %v150_v5, %v166_v18 }
  0x57   :  { %v173_v10 = vsel %vm65_vm0, %v155_v6, 0.0  ;;  %v174_v14 = vsel %vm65_vm0, %v159_v7, 0.0  ;;  %v176_v15 = vsel %vm65_vm0, %v163_v8, 0.0  ;;  %v178_v17 = vsel %vm65_vm0, %v167_v9, 0.0 }
  0x58   :  { %v175_v16 = vadd.f32 %v174_v14, %v173_v10 }
  0x5a   :  { %v177_v19 = vadd.f32 %v176_v15, %v175_v16 }
  0x5c   :  { %v179_v20 = vadd.f32 %v178_v17, %v177_v19 }
  0x5e   :  { %180 = vadd.xlane.f32.xlu1 %v179_v20 }
  0xa4   :  { %v97_v11 = vpop.xlane.xlu1 %96 }
  0xa5   :  { %v98_v21 = vrot.slane %v97_v11, 4 }
  0xa7   :  { %v99_v22 = vadd.f32 %v98_v21, %v97_v11 }
  0xa9   :  { %v100_v1 = vrot.slane %v99_v22, 2 }
  0xab   :  { %v101_v26 = vadd.f32 %v100_v1, %v99_v22 }
  0xac   :  { %v68_v12 = vpop.xlane.xlu0 %67 }
  0xad   :  { %v69_v23 = vrot.slane %v68_v12, 4  ;;  %v102_v31 = vrot.slane %v101_v26, 1 }
  0xaf   :  { %v70_v13 = vadd.f32 %v69_v23, %v68_v12  ;;  %v103_v35 = vadd.f32 %v102_v31, %v101_v26 }
  0xb0   :  { %v85_v18 = vpop.xlane.xlu0 %84 }
  0xb1   :  { %v71_v24 = vrot.slane %v70_v13, 2  ;;  %v86_v25 = vrot.slane %v85_v18, 4 }
  0xb3   :  { %v87_v27 = vadd.f32 %v86_v25, %v85_v18  ;;  %v72_v28 = vadd.f32 %v71_v24, %v70_v13 }
  0xb4   :  { %v222_v37 = vpop.xlane.xlu0 %221 }
  0xb5   :  { %v88_v29 = vrot.slane %v87_v27, 2  ;;  %v73_v30 = vrot.slane %v72_v28, 1  ;;  %v223_v38 = vrot.slane %v222_v37, 4 }
  0xb7   :  { %v74_v32 = vadd.f32 %v73_v30, %v72_v28  ;;  %v89_v33 = vadd.f32 %v88_v29, %v87_v27  ;;  %v224_v39 = vadd.f32 %v223_v38, %v222_v37 }
  0xb9   :  { %251 = vpush %v74_v32  ;;  %v90_v34 = vrot.slane %v89_v33, 1  ;;  %v225_v40 = vrot.slane %v224_v39, 2 }
  0xbb   :  { %v91_v36 = vadd.f32 %v90_v34, %v89_v33  ;;  %v226_v44 = vadd.f32 %v225_v40, %v224_v39 }
  0xbd   :  { %253 = vpush %v91_v36  ;;  %v227_v47 = vrot.slane %v226_v44, 1 }
  0xbe   :  { %255 = vpush %v103_v35 }
  0xbf   :  { %v228_v50 = vadd.f32 %v227_v47, %v226_v44 }
  0xe7   :  { %v181_v41 = vpop.xlane.xlu1 %180 }
  0xe8   :  { %v182_v42 = vrot.slane %v181_v41, 4 }
  0xea   :  { %v183_v43 = vadd.f32 %v182_v42, %v181_v41  ;;  %s252_s2 = spop %251 }
  0xeb   :  { %77 = sst [smem:[#allocation7 + $0x2]] %s252_s2 }
  0xec   :  { %v184_v45 = vrot.slane %v183_v43, 2 }
  0xee   :  { %v185_v46 = vadd.f32 %v184_v45, %v183_v43  ;;  %s254_s3 = spop %253 }
  0xef   :  { %94 = sst [smem:[#allocation7 + $0x3]] %s254_s3  ;;  %s256_s4 = spop %255 }
  0xf0   :  { %v186_v48 = vrot.slane %v185_v46, 1  ;;  %106 = sst [smem:[#allocation7 + $0x4]] %s256_s4 }
  0xf2   :  { %v187_v49 = vadd.f32 %v186_v48, %v185_v46 }
  0xf4   :  { %257 = vpush %v187_v49 }
  0xf5   :  { %259 = vpush %v228_v50 }
 0x125   :  { %s258_s5 = spop %257 }
 0x126   :  { %s260_s6 = spop %259  ;;  %191 = sst [smem:[#allocation7]] %s258_s5 }
 0x127   :  { %232 = sst [smem:[#allocation7 + $0x1]] %s260_s6 }
 0x128   :  { %240 = dma.smem_to_hbm %s329_s19, 16, %s430_s7, [#allocation4]  }
 0x129   :  { %324 = dma.done.wait [#allocation4], 16  }
 0x12a   :  { %325 = vsyncadd [#allocation4], 4294967280 }
 0x12b   :  { %244 = sfence }
 0x12c   :  { %245 = vsyncpa [#allocation3], 1 }
 0x12d   :  { %246 = vsyncpa [#allocation6], 1 }
 0x12e   :  { %247 = vsyncpa [#allocation4], 1 }

</bundles_post_ra>
